<compile_context>
chip_gen: v6e
topology: v6e:2x2x1
jax: 0.10.0
libtpu: 0.0.40
codegen_flags: <defaults>
</compile_context>

<pallas_src>
import jax
import jax.numpy as jnp
from jax.experimental import pallas as pl
from jax.experimental.pallas import tpu as pltpu

KH = KW = 11
SH = SW = 5
LANE = 128


def _round_up(x, m):
    return (x + m - 1) // m * m


def _im2col_T(x, kh, kw, sh, sw):
    """x: (N, C, H, W) -> transposed patches (N, C*kh*kw, Ho*Wo).

    K is ordered (C, kh, kw) to match weight.reshape(Cout, C*kh*kw); the patch
    axis P = Ho*Wo is last so it lands on the TPU lane axis inside the kernel.
    """
    N, C, H, W = x.shape
    Ho = (H - kh) // sh + 1
    Wo = (W - kw) // sw + 1
    pats = []
    for i in range(kh):
        for j in range(kw):
            pats.append(x[:, :, i:i + sh * Ho:sh, j:j + sw * Wo:sw])  # (N,C,Ho,Wo)
    pt = jnp.stack(pats, axis=0).reshape(kh, kw, N, C, Ho, Wo)
    pt = pt.transpose(2, 3, 0, 1, 4, 5)              # (N, C, kh, kw, Ho, Wo)
    return pt.reshape(N, C * kh * kw, Ho * Wo), Ho, Wo


def conv_sim_forward(x, weight, bn_gamma, bn_beta, bn_mean, bn_var, eps=1e-5,
                     tile_p=512):
    """x: (N, Cin, H, W) f32; weight: (Cout, Cin, 11, 11) f32 -> (N, Cout) f32."""
    N, Cin, H, W = x.shape
    Cout = weight.shape[0]

    # ---- wrapper-side im2col: bf16 FIRST, then pad with jnp.pad (perf review) ----
    x_bf = x.astype(jnp.bfloat16)
    pT, Ho, Wo = _im2col_T(x_bf, KH, KW, SH, SW)     # (N, K, P) bf16
    P = Ho * Wo
    K = Cin * KH * KW

    # Tile-aligned padded shapes: K (contraction, sublanes of pT) -> mult of 128,
    # weight sublanes -> mult of 16 (bf16 packing), elementwise/pool rows -> mult
    # of 8 (f32 sublane tile), patch lane tile TP -> mult of 128.
    Kp = _round_up(K, LANE)
    C_EW = _round_up(Cout, 8)
    C_MM = _round_up(Cout, 16)
    TP = _round_up(min(tile_p, _round_up(P, LANE)), LANE)
    Pp = _round_up(P, TP)
    num_p = Pp // TP

    pT = jnp.pad(pT, ((0, 0), (0, Kp - K), (0, Pp - P)))                     # bf16
    wT = jnp.pad(weight.reshape(Cout, K).astype(jnp.bfloat16),
                 ((0, C_MM - Cout), (0, Kp - K)))                            # bf16

    # Folded eval-mode BatchNorm2d (column vectors: Cout on sublanes).
    inv_std = 1.0 / jnp.sqrt(bn_var.astype(jnp.float32) + eps)
    g32 = bn_gamma.astype(jnp.float32)
    scale = jnp.pad((g32 * inv_std)[:, None], ((0, C_EW - Cout), (0, 0)))
    shift = jnp.pad((bn_beta.astype(jnp.float32)
                     - bn_mean.astype(jnp.float32) * g32 * inv_std)[:, None],
                    ((0, C_EW - Cout), (0, 0)))

    inv_p = 1.0 / float(P)

    def kernel(pT_ref, wT_ref, scale_ref, shift_ref, o_ref, acc_ref):
        p_idx = pl.program_id(1)

        @pl.when(p_idx == 0)
        def _():
            acc_ref[...] = jnp.zeros_like(acc_ref)

        # Conv as one MXU matmul, transposed so Cout sits on sublanes.
        y = jnp.dot(wT_ref[...], pT_ref[0],
                    preferred_element_type=jnp.float32)        # (C_MM, TP) f32

        # BatchNorm + SiLU only on the first C_EW sublanes (valid Cout rows).
        a = y[:C_EW, :] * scale_ref[...] + shift_ref[...]      # VPU, f32
        a = a * jax.nn.sigmoid(a)                              # EUP sigmoid, f32

        # AdaptiveAvgPool2d((1,1)) + Flatten: masked partial sum over the patch
        # (lane) axis (XLU), accumulated across P-chunks in an f32 scratch.
        col = jax.lax.broadcasted_iota(jnp.int32, a.shape, 1) + p_idx * TP
        a = jnp.where(col < P, a, 0.0)
        acc_ref[...] += jnp.sum(a, axis=1, keepdims=True)      # (C_EW, 1)

        @pl.when(p_idx == num_p - 1)
        def _():
            o_ref[...] = jnp.broadcast_to(acc_ref[...] * inv_p, o_ref.shape)

    cost = pl.CostEstimate(
        flops=2 * N * num_p * C_MM * Kp * TP,
        transcendentals=N * num_p * C_EW * TP,
        bytes_accessed=(N * Kp * Pp + C_MM * Kp) * 2
                       + 2 * C_EW * 4 + C_EW * N * LANE * 4,
    )

    out = pl.pallas_call(
        kernel,
        out_shape=jax.ShapeDtypeStruct((C_EW, N * LANE), jnp.float32),
        grid_spec=pltpu.PrefetchScalarGridSpec(
            num_scalar_prefetch=0,
            grid=(N, num_p),
            in_specs=[
                pl.BlockSpec((1, Kp, TP), lambda n, p: (n, 0, p)),   # patches^T
                pl.BlockSpec((C_MM, Kp), lambda n, p: (0, 0)),       # weight^T
                pl.BlockSpec((C_EW, 1), lambda n, p: (0, 0)),        # BN scale
                pl.BlockSpec((C_EW, 1), lambda n, p: (0, 0)),        # BN shift
            ],
            out_specs=pl.BlockSpec((C_EW, LANE), lambda n, p: (0, n)),
            scratch_shapes=[pltpu.VMEM((C_EW, 1), jnp.float32)],
        ),
        compiler_params=pltpu.CompilerParams(
            dimension_semantics=("parallel", "arbitrary"),
            vmem_limit_bytes=32 * 1024 * 1024,
        ),
        cost_estimate=cost,
    )(pT, wT, scale, shift)

    # (C_EW, N, 128): keep valid Cout rows, lane 0 of each per-sample block.
    return out.reshape(C_EW, N, LANE)[:Cout, :, 0].T


def _reference(x, weight, bn_gamma, bn_beta, bn_mean, bn_var, eps=1e-5):
    y = jax.lax.conv_general_dilated(
        x, weight, window_strides=(SH, SW), padding="VALID",
        dimension_numbers=("NCHW", "OIHW", "NCHW"),
        precision=jax.lax.Precision.HIGHEST)
    inv_std = 1.0 / jnp.sqrt(bn_var + eps)
    y = y * (bn_gamma * inv_std)[None, :, None, None] + \
        (bn_beta - bn_mean * bn_gamma * inv_std)[None, :, None, None]
    y = y * jax.nn.sigmoid(y)
    return y.mean(axis=(2, 3))


if __name__ == "__main__":
    # cfg.inchannel = 4, cfg.model_tiscls.num_tis_classes = 5 -> Cout = 4
    N, Cin, H, W = 2, 4, 16, 16
    Cout = 5 - 1

    key = jax.random.PRNGKey(0)
    kx, kw = jax.random.split(key)
    x = jax.random.normal(kx, (N, Cin, H, W), dtype=jnp.float32)

    # kaiming_normal_(mode='fan_out', nonlinearity='relu'): std = sqrt(2/(Cout*kh*kw))
    std = (2.0 / (Cout * KH * KW)) ** 0.5
    weight = std * jax.random.normal(kw, (Cout, Cin, KH, KW), dtype=jnp.float32)

    # BatchNorm2d per init_weights: weight=1, bias=1; running stats at defaults.
    bn_gamma = jnp.ones((Cout,), jnp.float32)
    bn_beta = jnp.ones((Cout,), jnp.float32)
    bn_mean = jnp.zeros((Cout,), jnp.float32)
    bn_var = jnp.ones((Cout,), jnp.float32)

    out = conv_sim_forward(x, weight, bn_gamma, bn_beta, bn_mean, bn_var)
    out = jax.block_until_ready(out)
    assert out.shape == (N, Cout)

    # Tight check: reference with the same bf16 operand rounding, f32 accumulation.
    xq = x.astype(jnp.bfloat16).astype(jnp.float32)
    wq = weight.astype(jnp.bfloat16).astype(jnp.float32)
    ref_q = _reference(xq, wq, bn_gamma, bn_beta, bn_mean, bn_var)
    assert jnp.allclose(out, ref_q, atol=5e-4, rtol=5e-4), (out, ref_q)

    # Loose check vs the pure-f32 PyTorch-equivalent path (only bf16 operand
    # rounding of the conv inputs separates the two).
    ref = _reference(x, weight, bn_gamma, bn_beta, bn_mean, bn_var)
    assert jnp.allclose(out, ref, atol=3e-2, rtol=3e-2), (out, ref)

    print("KERNEL_OK")
</pallas_src>

<mosaic_0001>
module attributes {stable_mosaic.version = 11 : i64} {
  func.func @kernel(%arg0: i32, %arg1: i32, %arg2: memref<1x512x128xbf16, #tpu.memory_space<vmem>>, %arg3: memref<16x512xbf16, #tpu.memory_space<vmem>>, %arg4: memref<8x1xf32, #tpu.memory_space<vmem>>, %arg5: memref<8x1xf32, #tpu.memory_space<vmem>>, %arg6: memref<8x128xf32, #tpu.memory_space<vmem>>, %arg7: memref<8x1xf32, #tpu.memory_space<vmem>>) attributes {dimension_semantics = [#tpu.dimension_semantics<parallel>, #tpu.dimension_semantics<arbitrary>], iteration_bounds = array<i64: 2, 1>, scalar_prefetch = 0 : i64, scratch_operands = 1 : i64, tpu.core_type = #tpu.core_type<tc>, window_params = [{transform_indices = @transform_0, window_bounds = array<i64: 1, 512, 128>}, {pipeline_mode = #tpu.pipeline_mode<synchronous>, transform_indices = @transform_1, window_bounds = array<i64: 16, 512>}, {pipeline_mode = #tpu.pipeline_mode<synchronous>, transform_indices = @transform_2, window_bounds = array<i64: 8, 1>}, {pipeline_mode = #tpu.pipeline_mode<synchronous>, transform_indices = @transform_3, window_bounds = array<i64: 8, 1>}, {transform_indices = @transform_4, window_bounds = array<i64: 8, 128>}]} {
    %c0_i32 = arith.constant 0 : i32
    %0 = arith.cmpi eq, %arg1, %c0_i32 : i32
    %1 = arith.extui %0 : i1 to i32
    %c0_i32_0 = arith.constant 0 : i32
    %2 = arith.cmpi ne, %1, %c0_i32_0 : i32
    scf.if %2 {
      %cst_18 = arith.constant 0.000000e+00 : f32
      %36 = vector.broadcast %cst_18 : f32 to vector<8x1xf32>
      %c0_19 = arith.constant 0 : index
      %c0_20 = arith.constant 0 : index
      %37 = vector.load %arg7[%c0_19, %c0_20] : memref<8x1xf32, #tpu.memory_space<vmem>>, vector<8x1xf32>
      tpu.vector_store %arg7[%c0_19, %c0_20], %36 {strides = array<i32>} : memref<8x1xf32, #tpu.memory_space<vmem>>, vector<8x1xf32>,
    } else {
    }
    %c0 = arith.constant 0 : index
    %c0_1 = arith.constant 0 : index
    %3 = vector.load %arg3[%c0, %c0_1] : memref<16x512xbf16, #tpu.memory_space<vmem>>, vector<16x512xbf16>
    %c0_2 = arith.constant 0 : index
    %c0_3 = arith.constant 0 : index
    %c0_4 = arith.constant 0 : index
    %4 = vector.load %arg2[%c0_2, %c0_3, %c0_4] : memref<1x512x128xbf16, #tpu.memory_space<vmem>>, vector<1x512x128xbf16>
    %5 = vector.shape_cast %4 : vector<1x512x128xbf16> to vector<512x128xbf16>
    %cst = arith.constant dense<0.000000e+00> : vector<16x128xf32>
    %6 = tpu.matmul %3, %5, %cst {dimension_numbers = #tpu.dot_dimension_numbers<[1], [0], [0], [1], [0, 0, 1, 1], [], []>} : vector<16x512xbf16>, vector<512x128xbf16>, vector<16x128xf32> -> vector<16x128xf32>
    %7 = vector.extract_strided_slice %6 {offsets = [0, 0], sizes = [8, 128], strides = [1, 1]} : vector<16x128xf32> to vector<8x128xf32>
    %c0_5 = arith.constant 0 : index
    %c0_6 = arith.constant 0 : index
    %8 = vector.load %arg4[%c0_5, %c0_6] : memref<8x1xf32, #tpu.memory_space<vmem>>, vector<8x1xf32>
    %9 = vector.broadcast %8 : vector<8x1xf32> to vector<8x128xf32>
    %10 = arith.mulf %7, %9 : vector<8x128xf32>
    %c0_7 = arith.constant 0 : index
    %c0_8 = arith.constant 0 : index
    %11 = vector.load %arg5[%c0_7, %c0_8] : memref<8x1xf32, #tpu.memory_space<vmem>>, vector<8x1xf32>
    %12 = vector.broadcast %11 : vector<8x1xf32> to vector<8x128xf32>
    %13 = arith.addf %10, %12 : vector<8x128xf32>
    %14 = arith.negf %13 : vector<8x128xf32>
    %15 = math.exp %14 : vector<8x128xf32>
    %cst_9 = arith.constant 1.000000e+00 : f32
    %16 = vector.broadcast %cst_9 : f32 to vector<8x128xf32>
    %17 = arith.addf %16, %15 : vector<8x128xf32>
    %18 = arith.divf %16, %17 : vector<8x128xf32>
    %19 = arith.mulf %13, %18 : vector<8x128xf32>
    %20 = tpu.iota {dimensions = array<i32: 1>} : vector<8x128xi32>
    %c128_i32 = arith.constant 128 : i32
    %21 = arith.muli %arg1, %c128_i32 : i32
    %22 = vector.broadcast %21 : i32 to vector<8x128xi32>
    %23 = arith.addi %20, %22 : vector<8x128xi32>
    %c4_i32 = arith.constant 4 : i32
    %24 = vector.broadcast %c4_i32 : i32 to vector<8x128xi32>
    %25 = arith.cmpi slt, %23, %24 : vector<8x128xi32>
    %cst_10 = arith.constant 0.000000e+00 : f32
    %26 = vector.broadcast %cst_10 : f32 to vector<8x128xf32>
    %27 = arith.select %25, %19, %26 : vector<8x128xi1>, vector<8x128xf32>
    %c0_11 = arith.constant 0 : index
    %c0_12 = arith.constant 0 : index
    %28 = vector.load %arg7[%c0_11, %c0_12] : memref<8x1xf32, #tpu.memory_space<vmem>>, vector<8x1xf32>
    %cst_13 = arith.constant dense<0.000000e+00> : vector<8xf32>
    %29 = vector.multi_reduction <add>, %27, %cst_13 [1] : vector<8x128xf32> to vector<8xf32>
    %30 = vector.shape_cast %29 : vector<8xf32> to vector<8x1xf32>
    %31 = arith.addf %28, %30 : vector<8x1xf32>
    %c0_14 = arith.constant 0 : index
    %c0_15 = arith.constant 0 : index
    %32 = vector.load %arg7[%c0_14, %c0_15] : memref<8x1xf32, #tpu.memory_space<vmem>>, vector<8x1xf32>
    tpu.vector_store %arg7[%c0_14, %c0_15], %31 {strides = array<i32>} : memref<8x1xf32, #tpu.memory_space<vmem>>, vector<8x1xf32>,
    %c0_i32_16 = arith.constant 0 : i32
    %33 = arith.cmpi eq, %arg1, %c0_i32_16 : i32
    %34 = arith.extui %33 : i1 to i32
    %c0_i32_17 = arith.constant 0 : i32
    %35 = arith.cmpi ne, %34, %c0_i32_17 : i32
    scf.if %35 {
      %c0_18 = arith.constant 0 : index
      %c0_19 = arith.constant 0 : index
      %36 = vector.load %arg7[%c0_18, %c0_19] : memref<8x1xf32, #tpu.memory_space<vmem>>, vector<8x1xf32>
      %cst_20 = arith.constant 2.500000e-01 : f32
      %37 = vector.broadcast %cst_20 : f32 to vector<8x1xf32>
      %38 = arith.mulf %36, %37 : vector<8x1xf32>
      %39 = vector.shape_cast %38 : vector<8x1xf32> to vector<8x1xf32>
      %40 = vector.broadcast %39 : vector<8x1xf32> to vector<8x128xf32>
      %c0_21 = arith.constant 0 : index
      %c0_22 = arith.constant 0 : index
      %41 = vector.load %arg6[%c0_21, %c0_22] : memref<8x128xf32, #tpu.memory_space<vmem>>, vector<8x128xf32>
      tpu.vector_store %arg6[%c0_21, %c0_22], %40 {strides = array<i32>} : memref<8x128xf32, #tpu.memory_space<vmem>>, vector<8x128xf32>,
    } else {
    }
    return
  }
  func.func @transform_0(%arg0: i32, %arg1: i32) -> (i32, i32, i32) {
    %c0_i32 = arith.constant 0 : i32
    %c0_i32_0 = arith.constant 0 : i32
    return %arg0, %c0_i32, %arg1 : i32, i32, i32
  }
  func.func @transform_1(%arg0: i32, %arg1: i32) -> (i32, i32) {
    %c0_i32 = arith.constant 0 : i32
    %c0_i32_0 = arith.constant 0 : i32
    %c0_i32_1 = arith.constant 0 : i32
    return %c0_i32, %c0_i32_0 : i32, i32
  }
  func.func @transform_2(%arg0: i32, %arg1: i32) -> (i32, i32) {
    %c0_i32 = arith.constant 0 : i32
    %c0_i32_0 = arith.constant 0 : i32
    %c0_i32_1 = arith.constant 0 : i32
    return %c0_i32, %c0_i32_0 : i32, i32
  }
  func.func @transform_3(%arg0: i32, %arg1: i32) -> (i32, i32) {
    %c0_i32 = arith.constant 0 : i32
    %c0_i32_0 = arith.constant 0 : i32
    %c0_i32_1 = arith.constant 0 : i32
    return %c0_i32, %c0_i32_0 : i32, i32
  }
  func.func @transform_4(%arg0: i32, %arg1: i32) -> (i32, i32) {
    %c0_i32 = arith.constant 0 : i32
    %c0_i32_0 = arith.constant 0 : i32
    return %c0_i32, %arg0 : i32, i32
  }
}

</mosaic_0001>

<bundles_post_ra>
// kernel: tpu_custom_call.1
= control target key start
LH: loop header
LB: loop body
LE: loop exit
PB: predicated region body
PF: predicated region fallthrough
CT: control target
= control target key end

     0   :  { %s1373_s0 = inlined_call_operand.hbm [shape: bf16[2,512,128], index: 0, kind: input, shape index: {}]   ;;  %s1374_s1 = inlined_call_operand.hbm [shape: bf16[16,512], index: 1, kind: input, shape index: {}]   ;;  %s1375_s2 = inlined_call_operand.vmem [shape: f32[8,1], index: 2, kind: input, shape index: {}]   ;;  %s1376_s3 = inlined_call_operand.vmem [shape: f32[8,1], index: 3, kind: input, shape index: {}]   ;;  %s1377_s4 = inlined_call_operand.hbm [shape: f32[8,256], index: 4, kind: output, shape index: {}]  }
   0x1   :  { %1379 = sst [smem:[#allocation12_spill]] %s1374_s1 }
   0x2   :  { %9 = vsyncpa [#allocation4], 0 }
   0x3   :  { %11 = vsyncpa [#allocation4 + $0x1], 0 }
   0x4   :  { %12 = vsyncpa [#allocation7], 0 }
   0x5   :  { %13 = vsyncpa [#allocation5], 0 }
   0x6   :  { %15 = vsyncpa [#allocation5 + $0x1], 0  ;;  %s1157_s15 = smov 0   ;;  %s1159_s16 = smov 0  }
   0x7   :  { %s1161_s17 = smov 0   ;;  %s1163_s18 = smov 0  }
   0x8   :  { %s1165_s19 = smov 0   ;;  %s1167_s20 = smov 0  }
   0x9 LB: > { %s762_s21 = sadd.s32 4294967295, %s1121_s20   ;;  %s763_s22 = sadd.s32 4294967294, %s1121_s20   ;;  %s1121_s20 = sphi %s1167_s20, %s21_s20   ;;  %s1117_s19 = sphi %s1165_s19, %s1397_s19   ;;  %s1113_s18 = sphi %s1163_s18, %s1396_s18   ;;  %s1109_s17 = sphi %s1161_s17, %s1395_s17   ;;  %s1105_s16 = sphi %s1159_s16, %s1394_s16   ;;  %s1101_s15 = sphi %s1157_s15, %s1393_s15  }
   0xa   : > { %p55_p0 = scmp.ne.s32.totalorder %s1105_s16, %s1101_s15  ;;  %p1191_p1 = scmp.eq.s32.totalorder %s762_s21, 0 }
   0xb   : > { %p1195_p2 = scmp.eq.s32.totalorder %s762_s21, 1  ;;  %p148_p3 = scmp.eq.s32.totalorder %s763_s22, 1 }
   0xc   : > { %p1201_p4 = por %p1191_p1, %p55_p0  ;;  %p764_p5 = scmp.ge.s32.totalorder %s1121_s20, 1 }
   0xd   : > { %p1206_p6 = por %p148_p3, %p55_p0  ;;  %p155_p7 = scmp.lt.s32.totalorder %s1121_s20, 3 }
   0xe   : > { %s1382_s25 = scalar_select %p1201_p4, 1, 0 }
   0xf   : > { %s1383_s26 = scalar_select %p1206_p6, 1, 0 }
  0x10   : > { %p1211_p8 = pnand %p764_p5, %p155_p7  ;;  %s1123_s28 = smov [#allocation6]  }
  0x11   : > { %s167_s29 = sshll.u32 %s1123_s28, 4  ;;  %s33_s5 = sadd.s32 1, %s1117_s19  ;;  %s168_s29 = int_to_ptr.vmem [resolvable:$true] %s167_s29 }
  0x12   : > { %p868_p9 = pneg %p1211_p8  ;;  %s994_s6 = scalar_lea.vmem %s168_s29, 512 }
  0x13   : > { %p995_p13 = scmp.ne.s32.totalorder %s168_s29, %s994_s6  ;;  %p1002_p5 = scmp.lt.s32.totalorder %s168_s29, %s168_s29 }
  0x14   : > { %p1220_p11 = pnand %p868_p9, %p1191_p1  ;;  %p1003_p7 = scmp.lt.s32.totalorder %s994_s6, %s994_s6 }
  0x16   : > { %p985_p12 = pneg %p1220_p11  ;;  %p1004_p6 = por %p1003_p7, %p1002_p5 }
  0x18   : > { %p997_p0 = pnand %p995_p13, %p985_p12 }
  0x1a   : > { %p998_p3 = pneg %p997_p0 }
  0x1c   : > { %p1005_p4 = pnand %p1004_p6, %p998_p3 }
  0x1e   : > { %1008 = shalt.err (!%p1005_p4)
}
  0x1f   : > { %s1124_s7 = smov 256   ;;  %s1125_s8 = smov 16  }
  0x20   : > { %s1386_s1 = sld [smem:[#allocation12_spill]]  ;;  %p35_p6 = scmp.ge.s32.totalorder %s33_s5, 2 }
  0x21   : > { %s42_s11 = sadd.s32 1, %s1109_s17  ;;  %p49_p4 = scmp.ne.s32.totalorder %s1109_s17, %s1105_s16 }
  0x22   : > { %p50_p9 = scmp.eq.s32.totalorder %s1121_s20, 0  ;;  %s1399_s5 = smov (%p35_p6, %s33_s5), 0 }
  0x23   : > { %p1244_p13 = por %p1195_p2, %p49_p4  ;;  %s37_s14 = ssub.s32 %s1117_s19, %s1399_s5 }
  0x24   : > { %p1238_p12 = por %p50_p9, %p49_p4  ;;  %p881_p0 = scmp.lt.s32.totalorder %s1121_s20, 2 }
  0x25   : > { %s187_s21 = sand.u32 1, %s1109_s17  }
  0x26   : > { %871 = dma.hbm_to_vmem [thread:$0]  (!%p1220_p11), %s1386_s1, 512, %s168_s29, [#allocation7], %s1124_s7, %s1124_s7, %s1125_s8  }
  0x27   : > { %p40_p11 = scmp.eq.s32.totalorder %s37_s14, 0  ;;  %s767_s22 = sshll.u32 %s187_s21, 8 }
  0x28   : > { %s815_s29 = sshll.u32 %s1117_s19, 12  ;;  %s191_s8 = scalar_lea.vmem [#allocation3], %s767_s22 }
  0x29   : > { %s1253_s28 = scalar_select %p40_p11, %s1109_s17, %s42_s11  }
  0x2a   : > { %s198_s7 = scalar_lea.hbm %s1373_s0, %s815_s29  ;;  %s199_s9 = sshll.u32 %s191_s8, 4  ;;  %s200_s9 = int_to_ptr.vmem [resolvable:$true] %s199_s9 }
  0x2b   : > { %p1261_p2 = pnand %p881_p0, %p1238_p12  ;;  %s188_s10 = scalar_lea.sflag [#allocation4], %s187_s21 }
  0x2c   : > { %s1022_s14 = scalar_lea.vmem %s200_s9, 4096  ;;  %s1126_s11 = smov [#allocation3]  }
  0x2d   : > { %p1011_p3 = pneg %p1261_p2  ;;  %p1023_p5 = scmp.ne.s32.totalorder %s200_s9, %s1022_s14 }
  0x2e   : > { %s1027_s1 = sshll.u32 %s1126_s11, 4  ;;  %s1028_s1 = int_to_ptr.vmem [resolvable:$false] %s1027_s1 }
  0x2f   : > { %p1025_p7 = pnand %p1023_p5, %p1011_p3  ;;  %s1029_s29 = scalar_lea.vmem %s1028_s1, 8192 }
  0x30   : > { %p1030_p4 = scmp.lt.s32.totalorder %s200_s9, %s1028_s1  ;;  %p1031_p9 = scmp.lt.s32.totalorder %s1029_s29, %s1022_s14 }
  0x31   : > { %p1026_p6 = pneg %p1025_p7 }
  0x32   : > { %p1032_p11 = por %p1031_p9, %p1030_p4 }
  0x34   : > { %p1033_p10 = pnand %p1032_p11, %p1026_p6 }
  0x36   : > { %1036 = shalt.err (!%p1033_p10)
}
  0x37   : > { %s1127_s12 = smov 64   ;;  %s1128_s22 = smov 4  }
  0x38   : > { %875 = dma.hbm_to_vmem [thread:$0]  (!%p1261_p2), %s198_s7, 4096, %s200_s9, %s188_s10, %s1127_s12, %s1127_s12, %s1128_s22  }
  0x39   : > { %211 = sbr.rel (%p1211_p8) target bundleno = 625 (0x271), region = 36  ;;  %s1272_s21 = sand.u32 (!%p1211_p8), 1, %s1105_s16  }
  0x3a   : > { %s771_s30 = sshll.u32 (!%p1211_p8), %s1272_s21, 8  ;;  %s214_s1 = scalar_lea.sflag (!%p1211_p8), [#allocation4], %s1272_s21 }
  0x3b   : > { %s1276_s6 = scalar_lea.vmem (!%p1211_p8), [#allocation3], %s771_s30  ;;  %p1390_p12 = scmp.ne.s32.totalorder (!%p1211_p8), %s1382_s25, 0 }
  0x3e   : > { %1088 = dma.done.wait (%p1390_p12), %s214_s1, 4096  }
  0x3f   : > { %1090 = vsyncadd (%p1390_p12), %s214_s1, 4294963200 }
  0x40   : > { %1092 = dma.done.wait (%p1191_p1), [#allocation7], 512  }
  0x41   : > { %1094 = vsyncadd (%p1191_p1), [#allocation7], 4294966784  ;;  %v1129_v0 = vmov 0   ;;  %v941_v1 = vld [vmem:[%s1276_s6 + $0x78] sm:$0xff]   ;;  %v945_v5 = vld [vmem:[%s1276_s6 + $0x70] sm:$0xff]   ;;  %vm251_vm0 = vcmask 7168   ;;  %v634_v58 = vlaneseq }
  0x42   : > { %939 = vset.pattern.permute.xlu0 %v1129_v0  ;;  %940 = vset.pattern.permute.xlu1 %v1129_v0  ;;  %v942_v2 = vld [vmem:[%s1276_s6 + $0xf8] sm:$0xff]   ;;  %v946_v6 = vld [vmem:[%s1276_s6 + $0xf0] sm:$0xff]   ;;  %v949_v9 = vld [vmem:[%s1276_s6 + $0x68] sm:$0xff]   ;;  %v1130_v39 = vmov 0.0   ;;  %s773_s8 = sshll.u32 %s1272_s21, 3  ;;  %s812_s10 = sshll.u32 %s1113_s18, 7 }
  0x43   : > { %816 = vmatprep.subr.bf16.mxu0 %v941_v1  ;;  %v943_v3 = vld [vmem:[%s1276_s6 + $0x38] sm:$0xff]   ;;  %838 = vmatprep.subr.bf16.mxu1 %v942_v2  ;;  %v947_v7 = vld [vmem:[%s1276_s6 + $0x30] sm:$0xff]   ;;  %v950_v10 = vld [vmem:[%s1276_s6 + $0xe8] sm:$0xff]   ;;  %252 = vst.msk [vmem:[#allocation2] sm:$0xff] %vm251_vm0, %v1130_v39  ;;  %v635_v59 = vand.u32 127, %v634_v58  ;;  %s245_s9 = scalar_lea.vmem [#allocation8], %s773_s8  ;;  %s670_s29 = scalar_lea.hbm %s1377_s4, %s812_s10 }
  0x44   : > { %v944_v4 = vld [vmem:[%s1276_s6 + $0xb8] sm:$0xff]   ;;  %817 = vmatpush3.bf16.msra.mxu0 %v943_v3  ;;  %v948_v8 = vld [vmem:[%s1276_s6 + $0xb0] sm:$0xff]   ;;  %v951_v11 = vld [vmem:[%s1276_s6 + $0x28] sm:$0xff]   ;;  %s672_s24 = sshll.u32 %s245_s9, 4  ;;  %s659_s12 = scalar_lea.sflag [#allocation5], %s1272_s21  ;;  %s1328_s24 = int_to_ptr.vmem [resolvable:$true] %s672_s24 }
  0x45   : > { %839 = vmatpush3.bf16.msra.mxu1 %v944_v4  ;;  %818 = vmatprep.subr.bf16.mxu0 %v945_v5  ;;  %v952_v12 = vld [vmem:[%s1276_s6 + $0xa8] sm:$0xff]   ;;  %v953_v13 = vld [vmem:[%s1276_s6 + $0x60] sm:$0xff]   ;;  %v957_v17 = vld [vmem:[%s1276_s6 + $0x58] sm:$0xff]   ;;  %vm639_vm1 = vcmp.lt.s32.totalorder %v635_v59, 4  ;;  %s1037_s22 = scalar_lea.vmem %s1328_s24, 128  ;;  %s1131_s30 = smov [#allocation8]  }
  0x46   : > { %840 = vmatprep.subr.bf16.mxu1 %v946_v6  ;;  %v954_v14 = vld [vmem:[%s1276_s6 + $0xe0] sm:$0xff]   ;;  %v958_v18 = vld [vmem:[%s1276_s6 + $0xd8] sm:$0xff]   ;;  %v961_v21 = vld [vmem:[%s1276_s6 + $0x50] sm:$0xff]   ;;  %p1038_p1 = scmp.ne.s32.totalorder %s1328_s24, %s1037_s22  ;;  %s1041_s1 = sshll.u32 %s1131_s30, 4  ;;  %s1042_s1 = int_to_ptr.vmem [resolvable:$false] %s1041_s1 }
  0x47   : > { %v955_v15 = vld [vmem:[%s1276_s6 + $0x20] sm:$0xff]   ;;  %v959_v19 = vld [vmem:[%s1276_s6 + $0x18] sm:$0xff]   ;;  %v962_v22 = vld [vmem:[%s1276_s6 + $0xd0] sm:$0xff]   ;;  %s1043_s18 = scalar_lea.vmem %s1042_s1, 256  ;;  %p1044_p0 = scmp.lt.s32.totalorder %s1328_s24, %s1042_s1 }
  0x48   : > { %819 = vmatpush3.bf16.msra.mxu0 %v947_v7  ;;  %v956_v16 = vld [vmem:[%s1276_s6 + $0xa0] sm:$0xff]   ;;  %v960_v20 = vld [vmem:[%s1276_s6 + $0x98] sm:$0xff]   ;;  %v963_v23 = vld [vmem:[%s1276_s6 + $0x10] sm:$0xff]   ;;  %p1039_p8 = pnand %p1038_p1, %p1244_p13  ;;  %p1045_p2 = scmp.lt.s32.totalorder %s1043_s18, %s1037_s22 }
  0x49   : > { %841 = vmatpush3.bf16.msra.mxu1 %v948_v8  ;;  %820 = vmatprep.subr.bf16.mxu0 %v949_v9  ;;  %v964_v24 = vld [vmem:[%s1276_s6 + $0x90] sm:$0xff]   ;;  %v965_v25 = vld [vmem:[%s1276_s6 + $0x48] sm:$0xff]   ;;  %v969_v29 = vld [vmem:[%s1276_s6 + $0x40] sm:$0xff]  }
  0x4a   : > { %842 = vmatprep.subr.bf16.mxu1 %v950_v10  ;;  %v966_v26 = vld [vmem:[%s1276_s6 + $0xc8] sm:$0xff]   ;;  %v970_v30 = vld [vmem:[%s1276_s6 + $0xc0] sm:$0xff]   ;;  %v613_v37 = vld [vmem:[%s1375_s2] sm:$0xff]  ;;  %p1040_p10 = pneg %p1039_p8  ;;  %p1046_p3 = por %p1045_p2, %p1044_p0 }
  0x4b   : > { %v967_v27 = vld [vmem:[%s1276_s6 + $0x8] sm:$0xff]   ;;  %v971_v31 = vld [vmem:[%s1276_s6] sm:$0xff]   ;;  %616 = vperm.xlu0 %939, %v613_v37   ;;  %v620_v38 = vld [vmem:[%s1376_s3] sm:$0xff] }
  0x4c   : > { %821 = vmatpush3.bf16.msra.mxu0 %v951_v11  ;;  %v968_v28 = vld [vmem:[%s1276_s6 + $0x88] sm:$0xff]   ;;  %v972_v32 = vld [vmem:[%s1276_s6 + $0x80] sm:$0xff]   ;;  %v641_v63 = vld [vmem:[#allocation2] sm:$0xff]  ;;  %p1047_p5 = pnand %p1046_p3, %p1040_p10 }
  0x4d   : > { %843 = vmatpush3.bf16.msra.mxu1 %v952_v12  ;;  %822 = vmatprep.subr.bf16.mxu0 %v953_v13  ;;  %v973_v33 = vld [vmem:[#allocation6] ss:$16 sps:$4 sm:$0xff]   ;;  %v975_v34 = vld [vmem:[#allocation6 + $0x4] ss:$16 sps:$4 sm:$0xff]   ;;  %v976_v35 = vld [vmem:[#allocation6 + $0x8] ss:$16 sps:$4 sm:$0xff]  }
  0x4e   : > { %844 = vmatprep.subr.bf16.mxu1 %v954_v14  ;;  %v978_v36 = vld [vmem:[#allocation6 + $0xc] ss:$16 sps:$4 sm:$0xff]   ;;  %565 = vmatprep.mubr.bf16.mxu0 %v975_v34 }
  0x4f   : > { %605 = vmatprep.mubr.bf16.mxu1 %v978_v36  ;;  %623 = vperm.xlu0 %939, %v620_v38  }
  0x50   : > { %823 = vmatpush3.bf16.msra.mxu0 %v955_v15 }
  0x51   : > { %845 = vmatpush3.bf16.msra.mxu1 %v956_v16  ;;  %824 = vmatprep.subr.bf16.mxu0 %v957_v17 }
  0x52   : > { %846 = vmatprep.subr.bf16.mxu1 %v958_v18 }
  0x54   : > { %825 = vmatpush3.bf16.msra.mxu0 %v959_v19 }
  0x55   : > { %847 = vmatpush3.bf16.msra.mxu1 %v960_v20  ;;  %826 = vmatprep.subr.bf16.mxu0 %v961_v21 }
  0x56   : > { %848 = vmatprep.subr.bf16.mxu1 %v962_v22 }
  0x58   : > { %827 = vmatpush3.bf16.msra.mxu0 %v963_v23 }
  0x59   : > { %849 = vmatpush3.bf16.msra.mxu1 %v964_v24  ;;  %828 = vmatprep.subr.bf16.mxu0 %v965_v25 }
  0x5a   : > { %850 = vmatprep.subr.bf16.mxu1 %v966_v26 }
  0x5c   : > { %829 = vmatpush3.bf16.msra.mxu0 %v967_v27 }
  0x5d   : > { %851 = vmatpush3.bf16.msra.mxu1 %v968_v28  ;;  %830 = vmatprep.subr.bf16.mxu0 %v969_v29 }
  0x5e   : > { %852 = vmatprep.subr.bf16.mxu1 %v970_v30 }
  0x60   : > { %831 = vmatpush3.bf16.msra.mxu0 %v971_v31 }
  0x61   : > { %853 = vmatpush3.bf16.msra.mxu1 %v972_v32 }
  0x63   : > { %566 = vmatmul.mubr.bf16.vlgmr.msra.gmra.mxu0 %v973_v33 }
  0x64   : > { %606 = vmatmul.mubr.bf16.vlgmr.msra.gmra.mxu1 %v976_v35 }
  0xc6   : > { %v617_v43 = vpop.permute.xlu0 %616 }
  0xca   : > { %v624_v53 = vpop.permute.xlu0 %623 }
 0x123   : > { %v832_v40 = vpop.f32.mrf.mxu0 }
 0x124   : > { %v854_v41 = vpop.f32.mrf.mxu1 }
 0x125   : > { %v833_v42 = vpop.f32.mrf.mxu0 }
 0x126   : > { %v834_v44 = vadd.f32 %v833_v42, %v832_v40  ;;  %v855_v45 = vpop.f32.mrf.mxu1 }
 0x127   : > { %v856_v46 = vadd.f32 %v855_v45, %v854_v41  ;;  %v835_v47 = vpop.f32.mrf.mxu0 }
 0x128   : > { %v857_v48 = vpop.f32.mrf.mxu1 }
 0x129   : > { %v608_v49 = vadd.f32 %v856_v46, %v834_v44  ;;  %v836_v50 = vpop.f32.mrf.mxu0 }
 0x12a   : > { %v858_v51 = vpop.f32.mrf.mxu1 }
 0x12b   : > { %v619_v52 = vmul.f32 %v617_v43, %v608_v49 }
 0x12d   : > { %v626_v54 = vadd.f32 %v624_v53, %v619_v52 }
 0x12f   : > { %v810_v55 = vmul.f32 -1.442695, %v626_v54 }
 0x131   : > { %979 = vpow2.f32 %v810_v55 }
 0x13e   : > { %v980_v56 = vpop.eup %979 }
 0x13f   : > { %v630_v57 = vadd.f32 1.0, %v980_v56 }
 0x141   : > { %981 = vrcp.f32 %v630_v57 }
 0x14e   : > { %v982_v60 = vpop.eup %981 }
 0x14f   : > { %v633_v61 = vmul.f32 %v982_v60, %v626_v54 }
 0x151   : > { %v640_v62 = vsel %vm639_vm1, %v633_v61, 0.0 }
 0x152   : > { %642 = vadd.xlane.f32.xlu1 %v640_v62 }
 0x1db   : > { %v643_v0 = vpop.xlane.xlu1 %642 }
 0x1dc   : > { %v644_v1 = vadd.f32 %v643_v0, %v641_v63 }
 0x1de   : > { %646 = vst.msk [vmem:[#allocation2] sm:$0xff] %vm251_vm0, %v644_v1 }
 0x1e5   : > { %v650_v2 = vld [vmem:[#allocation2] sm:$0xff] }
 0x1e6   : > { %v651_v3 = vmul.f32 0.25, %v650_v2 }
 0x1e8   : > { %654 = vperm.xlu1 %940, %v651_v3  }
 0x263   : > { %v655_v4 = vpop.permute.xlu1 %654 }
 0x264   : > { %657 = vst [vmem:[%s245_s9] sm:$0xff] %v655_v4 }
 0x265   : > { %1050 = shalt.err (!%p1047_p5)
}
 0x266   : > { %s1051_s6 = scalar_lea.hbm %s670_s29, 128  ;;  %s1055_s25 = scalar_lea.hbm %s1377_s4, 256 }
 0x267   : > { %p1052_p7 = scmp.ne.s32.totalorder %s670_s29, %s1051_s6  ;;  %p1056_p9 = scmp.lt.s32.totalorder %s670_s29, %s1377_s4 }
 0x268   : > { %p1057_p11 = scmp.lt.s32.totalorder %s1055_s25, %s1051_s6 }
 0x269   : > { %p1053_p6 = pnand %p1052_p7, %p1244_p13 }
 0x26a   : > { %p1058_p12 = por %p1057_p11, %p1056_p9 }
 0x26b   : > { %p1054_p4 = pneg %p1053_p6 }
 0x26d   : > { %p1059_p1 = pnand %p1058_p12, %p1054_p4 }
 0x26f   : > { %1062 = shalt.err (!%p1059_p1)
}
 0x270   : > { %866 = dma.vmem_to_hbm [thread:$0]  (%p1244_p13), %s1328_s24, 128, %s670_s29, %s659_s12  }
 0x271 PF: > { %s684_s8 = sand.u32 1, %s1101_s15   ;;  %p1391_p8 = scmp.ne.s32.totalorder %s1383_s26, 0 }
 0x272   : > { %p1392_p10 = scmp.ge.s32.totalorder %s1121_s20, 2  ;;  %s685_s9 = scalar_lea.sflag [#allocation5], %s684_s8 }
 0x274   : > { %p877_p0 = pnand %p1392_p10, %p1391_p8 }
 0x276   : > { %p878_p2 = pneg %p877_p0 }
 0x278   : > { %1096 = dma.done.wait (%p878_p2), %s685_s9, 128  }
 0x279   : > { %1098 = vsyncadd (%p878_p2), %s685_s9, 4294967168  ;;  %s21_s20 = sadd.s32 1, %s1121_s20   ;;  %s1393_s15 = smov %s1105_s16 }
 0x27a   : > { %p18_p3 = scmp.ge.s32.totalorder %s21_s20, 4   ;;  %s1394_s16 = smov %s1109_s17 }
 0x27b   : > { %s1395_s17 = smov %s1253_s28  ;;  %s1396_s18 = smov %s1117_s19 }
 0x27c   : > { %s1397_s19 = smov %s1399_s5  ;;  %20 = sbr.rel (!%p18_p3) target bundleno = 9 (0x9), region = 93 }
 0x281   :  { %690 = vsyncpa [#allocation4], 1 }
 0x282   :  { %692 = vsyncpa [#allocation4 + $0x1], 1 }
 0x283   :  { %693 = vsyncpa [#allocation7], 1 }
 0x284   :  { %694 = vsyncpa [#allocation5], 1 }
 0x285   :  { %696 = vsyncpa [#allocation5 + $0x1], 1 }

</bundles_post_ra>
